<compile_context>
chip_gen: v7x
topology: tpu7x:2x2x1
jax: 0.10.0
libtpu: 0.0.40
codegen_flags: <defaults>
</compile_context>

<pallas_src>
import functools
import math

import jax
import jax.numpy as jnp
from jax.experimental import pallas as pl
from jax.experimental.pallas import tpu as pltpu


def _refined_reciprocal(x):
    """EUP approx reciprocal + 2 Newton-Raphson steps (~f32 accurate).

    Only touches the small softmax-denominator vectors; the full
    (c_len, q_len) probability matrix is then normalized with a broadcast
    multiply instead of a divide.
    """
    r = pl.reciprocal(x, approx=True)
    r = r * (2.0 - x * r)
    r = r * (2.0 - x * r)
    return r


def bidaf_attention_kernel(c_ref, q_ref, cbias_ref, qbias_ref,
                           cw_ref, qw_ref, cqw_ref, bias_ref, out_ref,
                           *, mxu_bf16):
    f32 = jnp.float32
    Dp = c_ref.shape[-1]

    c_in = c_ref[0]            # (c_len, Dp)  input dtype (f32 or bf16)
    q_in = q_ref[0]            # (q_len, Dp)
    cbias = cbias_ref[0]       # (c_len, 1)  additive mask bias (0 or -1e30), f32
    qbias = qbias_ref[0]       # (1, q_len)  additive mask bias (0 or -1e30), f32
    bias = bias_ref[0]         # scalar (SMEM)

    # MXU operand dtype: bf16 when requested (v6e/v7x fast path), else input dtype.
    mdt = jnp.bfloat16 if mxu_bf16 else c_in.dtype
    c_m = c_in.astype(mdt)
    q_m = q_in.astype(mdt)

    # --- similarity matrix  s[i,j] = c_i.cw + q_j.qw + (c_i*cqw).q_j + bias ---
    # s0: VPU multiply + lane reduction (avoids a wasteful N=1 MXU matmul).
    s0 = jnp.sum(c_in * cw_ref[...], axis=1, keepdims=True, dtype=f32)      # (c_len, 1)
    # s1: one tiny M=1 matmul; the (1, q_len) result is already lane-major.
    s1 = jax.lax.dot_general(qw_ref[...].astype(mdt), q_m,
                             (((1,), (1,)), ((), ())),
                             preferred_element_type=f32)                    # (1, q_len)
    # s2: contract over Dp without an explicit transpose of q.
    s2 = jax.lax.dot_general((c_in * cqw_ref[...]).astype(mdt), q_m,
                             (((1,), (1,)), ((), ())),
                             preferred_element_type=f32)                    # (c_len, q_len)
    s = s2 + (s0 + bias) + s1                                               # (c_len, q_len)

    # --- masked softmax over the query axis (dim=2 in the torch module) ---
    # Additive mask bias instead of jnp.where; masked entries underflow to 0.
    lq = s + qbias
    eq = jnp.exp(lq - jnp.max(lq, axis=1, keepdims=True))
    p1 = eq * _refined_reciprocal(jnp.sum(eq, axis=1, keepdims=True))       # (c_len, q_len)

    # --- masked softmax over the context axis (dim=1) ---
    lc = s + cbias
    ec = jnp.exp(lc - jnp.max(lc, axis=0, keepdims=True))
    p2 = ec * _refined_reciprocal(jnp.sum(ec, axis=0, keepdims=True))       # (c_len, q_len)

    # --- attended vectors; b reassociated: p1 @ (p2^T @ c) ---
    p1m = p1.astype(mdt)
    p2m = p2.astype(mdt)
    a = jnp.dot(p1m, q_m, preferred_element_type=f32)                       # (c_len, Dp)
    q2c = jax.lax.dot_general(p2m, c_m, (((0,), (0,)), ((), ())),
                              preferred_element_type=f32)                   # (q_len, Dp)
    b = jnp.dot(p1m, q2c.astype(mdt), preferred_element_type=f32)           # (c_len, Dp)

    # --- direct lane-slice stores of the four chunks (no concatenate temp) ---
    # Dp is a multiple of 128, so these are unmasked lane-dense stores.
    c_f = c_in.astype(f32)
    od = out_ref.dtype
    out_ref[0, :, 0 * Dp:1 * Dp] = c_in.astype(od)
    out_ref[0, :, 1 * Dp:2 * Dp] = a.astype(od)
    out_ref[0, :, 2 * Dp:3 * Dp] = (c_f * a).astype(od)
    out_ref[0, :, 3 * Dp:4 * Dp] = (c_f * b).astype(od)


def bidaf_attention(c, q, c_mask, q_mask, c_weight, q_weight, cq_weight, bias,
                    *, out_dtype=None, prefer_bf16_matmul=False):
    B, c_len, D = c.shape
    q_len = q.shape[1]
    out_dtype = c.dtype if out_dtype is None else out_dtype

    # --- pad D to a lane-aligned multiple of 128 (zeros are exact no-ops for
    # s0/s2/a/b and the output chunks; valid columns are sliced back out) ---
    Dp = ((D + 127) // 128) * 128
    pad = Dp - D
    cw = c_weight.reshape(D)
    qwv = q_weight.reshape(D)
    cqw = cq_weight.reshape(D)
    if pad:
        c = jnp.pad(c, ((0, 0), (0, 0), (0, pad)))
        q = jnp.pad(q, ((0, 0), (0, 0), (0, pad)))
        cw = jnp.pad(cw, ((0, pad),))
        qwv = jnp.pad(qwv, ((0, pad),))
        cqw = jnp.pad(cqw, ((0, pad),))

    # Lane-dense (1, Dp) parameter rows in the input dtype.
    cw = cw.reshape(1, Dp).astype(c.dtype)
    qwv = qwv.reshape(1, Dp).astype(q.dtype)
    cqw = cqw.reshape(1, Dp).astype(c.dtype)
    bias = bias.reshape(1).astype(jnp.float32)

    # Additive mask biases (valid -> 0, masked -> -1e30), f32.
    cbias = ((c_mask.astype(jnp.float32) - 1.0) * 1e30).reshape(B, c_len, 1)
    qbias = ((q_mask.astype(jnp.float32) - 1.0) * 1e30).reshape(B, 1, q_len)

    in_bytes = jnp.dtype(c.dtype).itemsize
    out_bytes = jnp.dtype(out_dtype).itemsize

    # VMEM budget: double-buffered blocks + live f32 temporaries, capped with
    # headroom for v7x's 64 MiB physical VMEM (v5e default scoped is 16 MiB).
    block_bytes = (c_len * Dp * in_bytes + q_len * Dp * in_bytes
                   + c_len * 4 + q_len * 4
                   + c_len * 4 * Dp * out_bytes)
    temp_bytes = 8 * c_len * q_len * 4 + 6 * c_len * Dp * 4
    vmem_limit = int(min(max(2 * block_bytes + temp_bytes, 32 * 1024 * 1024),
                         56 * 1024 * 1024))

    cost = pl.CostEstimate(
        flops=int(8 * B * c_len * q_len * Dp),
        transcendentals=int(2 * B * c_len * q_len),
        bytes_accessed=int(B * (c_len + q_len) * Dp * in_bytes
                           + B * (c_len + q_len) * 4
                           + B * c_len * 4 * Dp * out_bytes))

    kernel = functools.partial(
        bidaf_attention_kernel,
        mxu_bf16=bool(prefer_bf16_matmul and c.dtype == jnp.float32))

    out = pl.pallas_call(
        kernel,
        out_shape=jax.ShapeDtypeStruct((B, c_len, 4 * Dp), out_dtype),
        grid_spec=pltpu.PrefetchScalarGridSpec(
            num_scalar_prefetch=0,
            grid=(B,),
            in_specs=[
                pl.BlockSpec((1, c_len, Dp), lambda b: (b, 0, 0)),     # c
                pl.BlockSpec((1, q_len, Dp), lambda b: (b, 0, 0)),     # q
                pl.BlockSpec((1, c_len, 1), lambda b: (b, 0, 0)),      # c mask bias
                pl.BlockSpec((1, 1, q_len), lambda b: (b, 0, 0)),      # q mask bias
                pl.BlockSpec((1, Dp), lambda b: (0, 0)),               # c_weight row
                pl.BlockSpec((1, Dp), lambda b: (0, 0)),               # q_weight row
                pl.BlockSpec((1, Dp), lambda b: (0, 0)),               # cq_weight row
                pl.BlockSpec(memory_space=pltpu.MemorySpace.SMEM),     # bias scalar
            ],
            out_specs=pl.BlockSpec((1, c_len, 4 * Dp), lambda b: (b, 0, 0)),
        ),
        compiler_params=pltpu.CompilerParams(
            dimension_semantics=("parallel",),
            vmem_limit_bytes=vmem_limit),
        cost_estimate=cost,
    )(c, q, cbias, qbias, cw, qwv, cqw, bias)

    if pad:
        out = out.reshape(B, c_len, 4, Dp)[..., :D].reshape(B, c_len, 4 * D)
    return out


# ----------------------------- pure-JAX reference ---------------------------
def bidaf_reference(c, q, c_mask, q_mask, cw, qw, cqw, bias):
    B, c_len, D = c.shape
    q_len = q.shape[1]
    hi = jax.lax.Precision.HIGHEST  # full-f32 reference matmuls
    s0 = jnp.einsum('bch,hk->bck', c, cw, precision=hi)                      # (B, c_len, 1)
    s1 = jnp.swapaxes(jnp.einsum('bqh,hk->bqk', q, qw, precision=hi), 1, 2)  # (B, 1, q_len)
    s2 = jnp.einsum('bch,bqh->bcq', c * cqw.reshape(1, 1, D), q, precision=hi)
    s = s0 + s1 + s2 + bias[0]
    cm = c_mask.astype(jnp.float32).reshape(B, c_len, 1)
    qm = q_mask.astype(jnp.float32).reshape(B, 1, q_len)

    def masked_softmax(logits, mask, axis):
        ml = mask * logits + (1.0 - mask) * (-1e30)
        return jax.nn.softmax(ml, axis=axis)

    p1 = masked_softmax(s, qm, 2)
    p2 = masked_softmax(s, cm, 1)
    a = jnp.einsum('bcq,bqh->bch', p1, q, precision=hi)
    b = jnp.einsum('bcd,bdh->bch',
                   jnp.einsum('bcq,bdq->bcd', p1, p2, precision=hi),
                   c, precision=hi)
    return jnp.concatenate([c, a, c * a, c * b], axis=-1)


def xavier_uniform(key, shape, fan_in, fan_out):
    bound = math.sqrt(6.0 / (fan_in + fan_out))
    return jax.random.uniform(key, shape, jnp.float32, -bound, bound)


def make_inputs(key, B, c_len, q_len, D):
    k_c, k_q, k_cw, k_qw, k_cqw = jax.random.split(key, 5)
    c = jax.random.normal(k_c, (B, c_len, D), jnp.float32)
    q = jax.random.normal(k_q, (B, q_len, D), jnp.float32)
    # valid-length masks (1 = keep, 0 = masked out), deterministic
    c_lens = jnp.array([c_len] + [max(1, c_len - 5)] * (B - 1), jnp.int32)
    q_lens = jnp.array([q_len] + [max(1, q_len - 3)] * (B - 1), jnp.int32)
    c_mask = (jnp.arange(c_len)[None, :] < c_lens[:, None]).astype(jnp.float32)
    q_mask = (jnp.arange(q_len)[None, :] < q_lens[:, None]).astype(jnp.float32)
    # parameters (shapes from BiDAFAttention.__init__), xavier_uniform init
    c_weight = xavier_uniform(k_cw, (D, 1), fan_in=1, fan_out=D)
    q_weight = xavier_uniform(k_qw, (D, 1), fan_in=1, fan_out=D)
    cq_weight = xavier_uniform(k_cqw, (1, 1, D), fan_in=D, fan_out=D)
    bias = jnp.zeros((1,), jnp.float32)
    return c, q, c_mask, q_mask, c_weight, q_weight, cq_weight, bias


if __name__ == "__main__":
    key0, key1 = jax.random.split(jax.random.PRNGKey(0), 2)

    # 1) Lane-aligned D (multiple of 128), f32 in / f32 out, tight check.
    args = make_inputs(key0, B=2, c_len=16, q_len=8, D=128)
    out = jax.block_until_ready(bidaf_attention(*args))
    ref = bidaf_reference(*args)
    assert out.shape == ref.shape, (out.shape, ref.shape)
    err = float(jnp.max(jnp.abs(out - ref)))
    assert jnp.allclose(out, ref, rtol=5e-4, atol=5e-4), err

    # 2) Non-128-aligned D (production BiDAF-style) exercising the pad path.
    args2 = make_inputs(key1, B=2, c_len=12, q_len=7, D=96)
    out2 = jax.block_until_ready(bidaf_attention(*args2))
    ref2 = bidaf_reference(*args2)
    assert out2.shape == ref2.shape, (out2.shape, ref2.shape)
    err2 = float(jnp.max(jnp.abs(out2 - ref2)))
    assert jnp.allclose(out2, ref2, rtol=5e-4, atol=5e-4), err2

    # 3) bf16-at-the-MXU + bf16 output (v6e/v7x fast path), loose check.
    out3 = jax.block_until_ready(
        bidaf_attention(*args, out_dtype=jnp.bfloat16, prefer_bf16_matmul=True))
    out3 = out3.astype(jnp.float32)
    assert out3.shape == ref.shape, (out3.shape, ref.shape)
    assert bool(jnp.all(jnp.isfinite(out3)))
    err3 = float(jnp.max(jnp.abs(out3 - ref)))
    assert jnp.allclose(out3, ref, rtol=1e-1, atol=5e-1), err3

    print("KERNEL_OK")
</pallas_src>

<mosaic_0001>
module attributes {stable_mosaic.version = 11 : i64} {
  func.func @bidaf_attention_kernel(%arg0: i32, %arg1: memref<1x16x128xf32, #tpu.memory_space<vmem>>, %arg2: memref<1x8x128xf32, #tpu.memory_space<vmem>>, %arg3: memref<1x16x1xf32, #tpu.memory_space<vmem>>, %arg4: memref<1x1x8xf32, #tpu.memory_space<vmem>>, %arg5: memref<1x128xf32, #tpu.memory_space<vmem>>, %arg6: memref<1x128xf32, #tpu.memory_space<vmem>>, %arg7: memref<1x128xf32, #tpu.memory_space<vmem>>, %arg8: memref<1xf32, #tpu.memory_space<smem>>, %arg9: memref<1x16x512xf32, #tpu.memory_space<vmem>>) attributes {dimension_semantics = [#tpu.dimension_semantics<parallel>], iteration_bounds = array<i64: 2>, scalar_prefetch = 0 : i64, scratch_operands = 0 : i64, tpu.core_type = #tpu.core_type<tc>, window_params = [{transform_indices = @transform_0, window_bounds = array<i64: 1, 16, 128>}, {transform_indices = @transform_1, window_bounds = array<i64: 1, 8, 128>}, {transform_indices = @transform_2, window_bounds = array<i64: 1, 16, 1>}, {transform_indices = @transform_3, window_bounds = array<i64: 1, 1, 8>}, {pipeline_mode = #tpu.pipeline_mode<synchronous>, transform_indices = @transform_4, window_bounds = array<i64: 1, 128>}, {pipeline_mode = #tpu.pipeline_mode<synchronous>, transform_indices = @transform_5, window_bounds = array<i64: 1, 128>}, {pipeline_mode = #tpu.pipeline_mode<synchronous>, transform_indices = @transform_6, window_bounds = array<i64: 1, 128>}, {transform_indices = @transform_7, window_bounds = array<i64: 1>}, {transform_indices = @transform_8, window_bounds = array<i64: 1, 16, 512>}]} {
    %c0 = arith.constant 0 : index
    %c0_0 = arith.constant 0 : index
    %c0_1 = arith.constant 0 : index
    %0 = vector.load %arg1[%c0, %c0_0, %c0_1] : memref<1x16x128xf32, #tpu.memory_space<vmem>>, vector<1x16x128xf32>
    %1 = vector.shape_cast %0 : vector<1x16x128xf32> to vector<16x128xf32>
    %c0_2 = arith.constant 0 : index
    %c0_3 = arith.constant 0 : index
    %c0_4 = arith.constant 0 : index
    %2 = vector.load %arg2[%c0_2, %c0_3, %c0_4] : memref<1x8x128xf32, #tpu.memory_space<vmem>>, vector<1x8x128xf32>
    %3 = vector.shape_cast %2 : vector<1x8x128xf32> to vector<8x128xf32>
    %c0_5 = arith.constant 0 : index
    %c0_6 = arith.constant 0 : index
    %c0_7 = arith.constant 0 : index
    %4 = vector.load %arg3[%c0_5, %c0_6, %c0_7] : memref<1x16x1xf32, #tpu.memory_space<vmem>>, vector<1x16x1xf32>
    %5 = vector.shape_cast %4 : vector<1x16x1xf32> to vector<16x1xf32>
    %c0_8 = arith.constant 0 : index
    %c0_9 = arith.constant 0 : index
    %c0_10 = arith.constant 0 : index
    %6 = vector.load %arg4[%c0_8, %c0_9, %c0_10] : memref<1x1x8xf32, #tpu.memory_space<vmem>>, vector<1x1x8xf32>
    %7 = vector.shape_cast %6 : vector<1x1x8xf32> to vector<1x8xf32>
    %c0_11 = arith.constant 0 : index
    %8 = memref.load %arg8[%c0_11] : memref<1xf32, #tpu.memory_space<smem>>
    %c0_12 = arith.constant 0 : index
    %c0_13 = arith.constant 0 : index
    %9 = vector.load %arg5[%c0_12, %c0_13] : memref<1x128xf32, #tpu.memory_space<vmem>>, vector<1x128xf32>
    %10 = vector.broadcast %9 : vector<1x128xf32> to vector<16x128xf32>
    %11 = arith.mulf %1, %10 : vector<16x128xf32>
    %cst = arith.constant dense<0.000000e+00> : vector<16xf32>
    %12 = vector.multi_reduction <add>, %11, %cst [1] : vector<16x128xf32> to vector<16xf32>
    %13 = vector.shape_cast %12 : vector<16xf32> to vector<16x1xf32>
    %c0_14 = arith.constant 0 : index
    %c0_15 = arith.constant 0 : index
    %14 = vector.load %arg6[%c0_14, %c0_15] : memref<1x128xf32, #tpu.memory_space<vmem>>, vector<1x128xf32>
    %cst_16 = arith.constant dense<0.000000e+00> : vector<1x8xf32>
    %15 = tpu.matmul %14, %3, %cst_16 {dimension_numbers = #tpu.dot_dimension_numbers<[1], [1], [0], [0], [0, 0, 1, 0], [], []>} : vector<1x128xf32>, vector<8x128xf32>, vector<1x8xf32> -> vector<1x8xf32>
    %c0_17 = arith.constant 0 : index
    %c0_18 = arith.constant 0 : index
    %16 = vector.load %arg7[%c0_17, %c0_18] : memref<1x128xf32, #tpu.memory_space<vmem>>, vector<1x128xf32>
    %17 = vector.broadcast %16 : vector<1x128xf32> to vector<16x128xf32>
    %18 = arith.mulf %1, %17 : vector<16x128xf32>
    %cst_19 = arith.constant dense<0.000000e+00> : vector<16x8xf32>
    %19 = tpu.matmul %18, %3, %cst_19 {dimension_numbers = #tpu.dot_dimension_numbers<[1], [1], [0], [0], [0, 0, 1, 0], [], []>} : vector<16x128xf32>, vector<8x128xf32>, vector<16x8xf32> -> vector<16x8xf32>
    %20 = vector.broadcast %8 : f32 to vector<16x1xf32>
    %21 = arith.addf %13, %20 : vector<16x1xf32>
    %22 = vector.broadcast %21 : vector<16x1xf32> to vector<16x8xf32>
    %23 = arith.addf %19, %22 : vector<16x8xf32>
    %24 = vector.broadcast %15 : vector<1x8xf32> to vector<16x8xf32>
    %25 = arith.addf %23, %24 : vector<16x8xf32>
    %26 = vector.broadcast %7 : vector<1x8xf32> to vector<16x8xf32>
    %27 = arith.addf %25, %26 : vector<16x8xf32>
    %cst_20 = arith.constant dense<0xFF800000> : vector<16xf32>
    %28 = vector.multi_reduction <maximumf>, %27, %cst_20 [1] : vector<16x8xf32> to vector<16xf32>
    %29 = vector.shape_cast %28 : vector<16xf32> to vector<16x1xf32>
    %30 = vector.broadcast %29 : vector<16x1xf32> to vector<16x8xf32>
    %31 = arith.subf %27, %30 : vector<16x8xf32>
    %32 = math.exp %31 : vector<16x8xf32>
    %cst_21 = arith.constant dense<0.000000e+00> : vector<16xf32>
    %33 = vector.multi_reduction <add>, %32, %cst_21 [1] : vector<16x8xf32> to vector<16xf32>
    %34 = vector.shape_cast %33 : vector<16xf32> to vector<16x1xf32>
    %35 = tpu.reciprocal %34 {approx = true} : vector<16x1xf32> -> vector<16x1xf32>
    %36 = arith.mulf %34, %35 : vector<16x1xf32>
    %cst_22 = arith.constant 2.000000e+00 : f32
    %37 = vector.broadcast %cst_22 : f32 to vector<16x1xf32>
    %38 = arith.subf %37, %36 : vector<16x1xf32>
    %39 = arith.mulf %35, %38 : vector<16x1xf32>
    %40 = arith.mulf %34, %39 : vector<16x1xf32>
    %cst_23 = arith.constant 2.000000e+00 : f32
    %41 = vector.broadcast %cst_23 : f32 to vector<16x1xf32>
    %42 = arith.subf %41, %40 : vector<16x1xf32>
    %43 = arith.mulf %39, %42 : vector<16x1xf32>
    %44 = vector.broadcast %43 : vector<16x1xf32> to vector<16x8xf32>
    %45 = arith.mulf %32, %44 : vector<16x8xf32>
    %46 = vector.broadcast %5 : vector<16x1xf32> to vector<16x8xf32>
    %47 = arith.addf %25, %46 : vector<16x8xf32>
    %cst_24 = arith.constant dense<0xFF800000> : vector<8xf32>
    %48 = vector.multi_reduction <maximumf>, %47, %cst_24 [0] : vector<16x8xf32> to vector<8xf32>
    %49 = vector.shape_cast %48 : vector<8xf32> to vector<1x8xf32>
    %50 = vector.broadcast %49 : vector<1x8xf32> to vector<16x8xf32>
    %51 = arith.subf %47, %50 : vector<16x8xf32>
    %52 = math.exp %51 : vector<16x8xf32>
    %cst_25 = arith.constant dense<0.000000e+00> : vector<8xf32>
    %53 = vector.multi_reduction <add>, %52, %cst_25 [0] : vector<16x8xf32> to vector<8xf32>
    %54 = vector.shape_cast %53 : vector<8xf32> to vector<1x8xf32>
    %55 = tpu.reciprocal %54 {approx = true} : vector<1x8xf32> -> vector<1x8xf32>
    %56 = arith.mulf %54, %55 : vector<1x8xf32>
    %cst_26 = arith.constant 2.000000e+00 : f32
    %57 = vector.broadcast %cst_26 : f32 to vector<1x8xf32>
    %58 = arith.subf %57, %56 : vector<1x8xf32>
    %59 = arith.mulf %55, %58 : vector<1x8xf32>
    %60 = arith.mulf %54, %59 : vector<1x8xf32>
    %cst_27 = arith.constant 2.000000e+00 : f32
    %61 = vector.broadcast %cst_27 : f32 to vector<1x8xf32>
    %62 = arith.subf %61, %60 : vector<1x8xf32>
    %63 = arith.mulf %59, %62 : vector<1x8xf32>
    %64 = vector.broadcast %63 : vector<1x8xf32> to vector<16x8xf32>
    %65 = arith.mulf %52, %64 : vector<16x8xf32>
    %cst_28 = arith.constant dense<0.000000e+00> : vector<16x128xf32>
    %66 = tpu.matmul %45, %3, %cst_28 {dimension_numbers = #tpu.dot_dimension_numbers<[1], [0], [0], [1], [0, 0, 1, 1], [], []>} : vector<16x8xf32>, vector<8x128xf32>, vector<16x128xf32> -> vector<16x128xf32>
    %cst_29 = arith.constant dense<0.000000e+00> : vector<8x128xf32>
    %67 = tpu.matmul %65, %1, %cst_29 {dimension_numbers = #tpu.dot_dimension_numbers<[0], [0], [1], [1], [0, 1, 1, 1], [], []>} : vector<16x8xf32>, vector<16x128xf32>, vector<8x128xf32> -> vector<8x128xf32>
    %cst_30 = arith.constant dense<0.000000e+00> : vector<16x128xf32>
    %68 = tpu.matmul %45, %67, %cst_30 {dimension_numbers = #tpu.dot_dimension_numbers<[1], [0], [0], [1], [0, 0, 1, 1], [], []>} : vector<16x8xf32>, vector<8x128xf32>, vector<16x128xf32> -> vector<16x128xf32>
    %c0_31 = arith.constant 0 : index
    %c0_32 = arith.constant 0 : index
    %c0_33 = arith.constant 0 : index
    %69 = vector.load %arg9[%c0_31, %c0_32, %c0_33] : memref<1x16x512xf32, #tpu.memory_space<vmem>>, vector<1x16x128xf32>
    %70 = vector.shape_cast %69 : vector<1x16x128xf32> to vector<16x128xf32>
    %71 = vector.shape_cast %1 : vector<16x128xf32> to vector<1x16x128xf32>
    tpu.vector_store %arg9[%c0_31, %c0_32, %c0_33], %71 {strides = array<i32>} : memref<1x16x512xf32, #tpu.memory_space<vmem>>, vector<1x16x128xf32>,
    %c0_34 = arith.constant 0 : index
    %c0_35 = arith.constant 0 : index
    %c128 = arith.constant 128 : index
    %72 = vector.load %arg9[%c0_34, %c0_35, %c128] : memref<1x16x512xf32, #tpu.memory_space<vmem>>, vector<1x16x128xf32>
    %73 = vector.shape_cast %72 : vector<1x16x128xf32> to vector<16x128xf32>
    %74 = vector.shape_cast %66 : vector<16x128xf32> to vector<1x16x128xf32>
    tpu.vector_store %arg9[%c0_34, %c0_35, %c128], %74 {strides = array<i32>} : memref<1x16x512xf32, #tpu.memory_space<vmem>>, vector<1x16x128xf32>,
    %75 = arith.mulf %1, %66 : vector<16x128xf32>
    %c0_36 = arith.constant 0 : index
    %c0_37 = arith.constant 0 : index
    %c256 = arith.constant 256 : index
    %76 = vector.load %arg9[%c0_36, %c0_37, %c256] : memref<1x16x512xf32, #tpu.memory_space<vmem>>, vector<1x16x128xf32>
    %77 = vector.shape_cast %76 : vector<1x16x128xf32> to vector<16x128xf32>
    %78 = vector.shape_cast %75 : vector<16x128xf32> to vector<1x16x128xf32>
    tpu.vector_store %arg9[%c0_36, %c0_37, %c256], %78 {strides = array<i32>} : memref<1x16x512xf32, #tpu.memory_space<vmem>>, vector<1x16x128xf32>,
    %79 = arith.mulf %1, %68 : vector<16x128xf32>
    %c0_38 = arith.constant 0 : index
    %c0_39 = arith.constant 0 : index
    %c384 = arith.constant 384 : index
    %80 = vector.load %arg9[%c0_38, %c0_39, %c384] : memref<1x16x512xf32, #tpu.memory_space<vmem>>, vector<1x16x128xf32>
    %81 = vector.shape_cast %80 : vector<1x16x128xf32> to vector<16x128xf32>
    %82 = vector.shape_cast %79 : vector<16x128xf32> to vector<1x16x128xf32>
    tpu.vector_store %arg9[%c0_38, %c0_39, %c384], %82 {strides = array<i32>} : memref<1x16x512xf32, #tpu.memory_space<vmem>>, vector<1x16x128xf32>,
    return
  }
  func.func @transform_0(%arg0: i32) -> (i32, i32, i32) {
    %c0_i32 = arith.constant 0 : i32
    %c0_i32_0 = arith.constant 0 : i32
    %c0_i32_1 = arith.constant 0 : i32
    return %arg0, %c0_i32, %c0_i32_0 : i32, i32, i32
  }
  func.func @transform_1(%arg0: i32) -> (i32, i32, i32) {
    %c0_i32 = arith.constant 0 : i32
    %c0_i32_0 = arith.constant 0 : i32
    %c0_i32_1 = arith.constant 0 : i32
    return %arg0, %c0_i32, %c0_i32_0 : i32, i32, i32
  }
  func.func @transform_2(%arg0: i32) -> (i32, i32, i32) {
    %c0_i32 = arith.constant 0 : i32
    %c0_i32_0 = arith.constant 0 : i32
    %c0_i32_1 = arith.constant 0 : i32
    return %arg0, %c0_i32, %c0_i32_0 : i32, i32, i32
  }
  func.func @transform_3(%arg0: i32) -> (i32, i32, i32) {
    %c0_i32 = arith.constant 0 : i32
    %c0_i32_0 = arith.constant 0 : i32
    %c0_i32_1 = arith.constant 0 : i32
    return %arg0, %c0_i32, %c0_i32_0 : i32, i32, i32
  }
  func.func @transform_4(%arg0: i32) -> (i32, i32) {
    %c0_i32 = arith.constant 0 : i32
    %c0_i32_0 = arith.constant 0 : i32
    %c0_i32_1 = arith.constant 0 : i32
    return %c0_i32, %c0_i32_0 : i32, i32
  }
  func.func @transform_5(%arg0: i32) -> (i32, i32) {
    %c0_i32 = arith.constant 0 : i32
    %c0_i32_0 = arith.constant 0 : i32
    %c0_i32_1 = arith.constant 0 : i32
    return %c0_i32, %c0_i32_0 : i32, i32
  }
  func.func @transform_6(%arg0: i32) -> (i32, i32) {
    %c0_i32 = arith.constant 0 : i32
    %c0_i32_0 = arith.constant 0 : i32
    %c0_i32_1 = arith.constant 0 : i32
    return %c0_i32, %c0_i32_0 : i32, i32
  }
  func.func @transform_7(%arg0: i32) -> i32 {
    %c0_i32 = arith.constant 0 : i32
    %c0_i32_0 = arith.constant 0 : i32
    return %c0_i32 : i32
  }
  func.func @transform_8(%arg0: i32) -> (i32, i32, i32) {
    %c0_i32 = arith.constant 0 : i32
    %c0_i32_0 = arith.constant 0 : i32
    %c0_i32_1 = arith.constant 0 : i32
    return %arg0, %c0_i32, %c0_i32_0 : i32, i32, i32
  }
}

</mosaic_0001>

<bundles_post_ra>
// kernel: tpu_custom_call.1
= control target key start
LH: loop header
LB: loop body
LE: loop exit
PB: predicated region body
PF: predicated region fallthrough
CT: control target
= control target key end

     0   :  { %s1567_s0 = inlined_call_operand.vmem [shape: f32[2,16,128], index: 0, kind: input, shape index: {}]   ;;  %s1568_s1 = inlined_call_operand.hbm [shape: f32[2,8,128], index: 1, kind: input, shape index: {}]   ;;  %s1569_s2 = inlined_call_operand.vmem [shape: f32[2,16,1], index: 2, kind: input, shape index: {}]   ;;  %s1570_s3 = inlined_call_operand.vmem [shape: f32[2,1,8], index: 3, kind: input, shape index: {}]   ;;  %s1571_s4 = inlined_call_operand.vmem [shape: f32[1,128], index: 4, kind: input, shape index: {}]   ;;  %s1572_s5 = inlined_call_operand.vmem [shape: f32[1,128], index: 5, kind: input, shape index: {}]   ;;  %s1573_s6 = inlined_call_operand.vmem [shape: f32[1,128], index: 6, kind: input, shape index: {}]   ;;  %s1574_s7 = inlined_call_operand.<no memory space> [shape: f32[1], index: 7, kind: input, shape index: {}]   ;;  %s1575_s8 = inlined_call_operand.hbm [shape: f32[2,16,512], index: 8, kind: output, shape index: {}]  }
   0x1   :  { %13 = sst [smem:[#allocation2]] %s1574_s7 }
   0x2   :  { %14 = vsyncpa [#allocation4], 0 }
   0x3   :  { %16 = vsyncpa [#allocation4 + $0x1], 0 }
   0x4   :  { %17 = vsyncpa [#allocation5], 0 }
   0x5   :  { %19 = vsyncpa [#allocation5 + $0x1], 0  ;;  %s1336_s29 = smov 0   ;;  %s1338_s30 = smov 0  }
   0x6   :  { %s1340_s9 = smov 0   ;;  %s1342_s10 = smov 0  }
   0x7 LB: > { %s1357_s7 = sadd.s32 4294967295, %s1278_s10   ;;  %s1042_s11 = sadd.s32 4294967294, %s1278_s10   ;;  %s1278_s10 = sphi %s1342_s10, %s1590_s10   ;;  %s1274_s9 = sphi %s1340_s9, %s1589_s9   ;;  %s1270_s30 = sphi %s1338_s30, %s1588_s30   ;;  %s1266_s29 = sphi %s1336_s29, %s1587_s29  }
   0x8   : > { %s1361_s12 = sadd.s32 1, %s1278_s10   ;;  %s58_s13 = sadd.s32 1, %s1274_s9 }
   0x9   : > { %s55_s14 = ssub.s32 %s1278_s10, %s1361_s12  ;;  %p65_p0 = scmp.ne.s32.totalorder %s1274_s9, %s1270_s30 }
   0xa   : > { %p56_p1 = scmp.eq.s32.totalorder %s55_s14, 0  ;;  %p66_p2 = scmp.eq.s32.totalorder %s1278_s10, 0 }
   0xb   : > { %p71_p3 = scmp.ne.s32.totalorder %s1270_s30, %s1266_s29  ;;  %p72_p4 = scmp.eq.s32.totalorder %s1357_s7, 0 }
   0xc   : > { %s1373_s15 = scalar_select %p56_p1, %s1274_s9, %s58_s13  }
   0xd   : > { %p1375_p5 = por %p66_p2, %p65_p0  ;;  %p1379_p6 = por %p72_p4, %p71_p3 }
   0xe   : > { %p231_p7 = scmp.eq.s32.totalorder %s1357_s7, 1  ;;  %p237_p8 = scmp.eq.s32.totalorder %s1042_s11, 1 }
   0xf   : > { %p1126_p10 = scmp.lt.s32.totalorder %s1278_s10, 2  ;;  %s277_s20 = sand.u32 1, %s1274_s9  }
  0x10   : > { %p1386_p11 = por %p231_p7, %p65_p0  ;;  %p1390_p12 = por %p237_p8, %p71_p3 }
  0x11   : > { %s1046_s21 = sshll.u32 %s1278_s10, 7  ;;  %s1045_s22 = sshll.u32 %s277_s20, 3 }
  0x12   : > { %s1579_s18 = scalar_select %p1386_p11, 1, 0 }
  0x13   : > { %s1580_s19 = scalar_select %p1390_p12, 1, 0 }
  0x14   : > { %s1399_s25 = scalar_lea.hbm %s1568_s1, %s1046_s21  ;;  %s281_s26 = scalar_lea.vmem [#allocation3], %s1045_s22 }
  0x15   : > { %s288_s27 = sshll.u32 %s281_s26, 4  ;;  %p1403_p13 = pnand %p1126_p10, %p1375_p5  ;;  %s1407_s27 = int_to_ptr.vmem [resolvable:$true] %s288_s27 }
  0x16   : > { %s278_s11 = scalar_lea.sflag [#allocation4], %s277_s20  ;;  %s1182_s13 = scalar_lea.hbm %s1399_s25, 128 }
  0x17   : > { %p1183_p2 = scmp.ne.s32.totalorder %s1399_s25, %s1182_s13  ;;  %p1184_p3 = pneg %p1403_p13 }
  0x18   : > { %s1187_s21 = scalar_lea.hbm %s1568_s1, 256  ;;  %p1188_p5 = scmp.lt.u32.totalorder %s1399_s25, %s1568_s1 }
  0x19   : > { %p1185_p4 = pnand %p1184_p3, %p1183_p2  ;;  %p1189_p8 = scmp.lt.u32.totalorder %s1187_s21, %s1182_s13 }
  0x1a   : > { %p1191_p9 = scmp.lt.u32.totalorder %s1182_s13, %s1399_s25 }
  0x1b   : > { %p1186_p7 = pneg %p1185_p4  ;;  %p1190_p10 = por %p1189_p8, %p1188_p5 }
  0x1d   : > { %p1192_p0 = por %p1191_p9, %p1190_p10 }
  0x1f   : > { %p1193_p1 = pnand %p1192_p0, %p1186_p7 }
  0x21   : > { %1196 = shalt.err (!%p1193_p1)
}
  0x22   : > { %s1197_s20 = scalar_lea.vmem %s1407_s27, 128  ;;  %s1280_s24 = smov [#allocation3]  }
  0x23   : > { %p1198_p2 = scmp.ne.s32.totalorder %s1407_s27, %s1197_s20  ;;  %s1202_s26 = sshll.u32 %s1280_s24, 4  ;;  %s1203_s26 = int_to_ptr.vmem [resolvable:$false] %s1202_s26 }
  0x24   : > { %s1204_s14 = scalar_lea.vmem %s1203_s26, 256  ;;  %p1205_p11 = scmp.lt.s32.totalorder %s1407_s27, %s1203_s26 }
  0x25   : > { %p1200_p4 = pnand %p1198_p2, %p1184_p3  ;;  %p1206_p5 = scmp.lt.s32.totalorder %s1204_s14, %s1197_s20 }
  0x27   : > { %p1201_p12 = pneg %p1200_p4  ;;  %p1207_p8 = por %p1206_p5, %p1205_p11 }
  0x29   : > { %p1208_p9 = pnand %p1207_p8, %p1201_p12 }
  0x2b   : > { %1211 = shalt.err (!%p1208_p9)
}
  0x2c   : > { %1121 = dma.hbm_to_vmem [thread:$0]  (!%p1403_p13), %s1399_s25, 128, %s1407_s27, %s278_s11  }
  0x2d   : > { %p1582_p0 = scmp.lt.s32.totalorder %s1278_s10, 3  ;;  %p1583_p1 = scmp.ge.s32.totalorder %s1278_s10, 1 }
  0x2f   : > { %p308_p3 = pnand %p1583_p1, %p1582_p0 }
  0x30   : > { %s1441_s13 = sand.u32 (!%p308_p3), 1, %s1270_s30  }
  0x31   : > { %311 = sbr.rel (%p308_p3) target bundleno = 930 (0x3a2), region = 52  ;;  %s1048_s16 = sshll.u32 (!%p308_p3), %s1441_s13, 3 }
  0x32   : > { %s314_s21 = scalar_lea.sflag (!%p308_p3), [#allocation4], %s1441_s13  ;;  %s317_s22 = scalar_lea.vmem (!%p308_p3), [#allocation3], %s1048_s16 }
  0x38   : > { %1257 = dma.done.wait (%p1379_p6), %s314_s21, 128  }
  0x39   : > { %1259 = vsyncadd (%p1379_p6), %s314_s21, 4294967168  ;;  %p363_p11 = scmp.lt.s32.totalorder %s1357_s7, 1  ;;  %v1281_v0 = vmov 0.0   ;;  %vm1282_vm0 = vmmov 0   ;;  %v1283_v1 = vmov 0   ;;  %s1049_s27 = sshll.u32 %s1441_s13, 6  ;;  %v554_v15 = vlaneseq }
  0x3a   : > { %1084 = vmatprep.subr.mxu0 %v1281_v0  ;;  %1086 = vmatprep.mubr.msk.f32.mxu0 %vm1282_vm0, %v1281_v0  ;;  %v378_v2 = vld [vmem:[%s317_s22] sm:$0xff]  ;;  %s1470_s21 = scalar_lea.vmem [#allocation6], %s1049_s27  ;;  %s382_s27 = sld [smem:[#allocation2]]  ;;  %vm568_vm1 = vcmask 64512   ;;  %v1284_v61 = vmov 0.0|0.0   ;;  %vm761_vm2 = vcmask 130048  }
  0x3b   : > { %s1452_s25 = scalar_select %p363_p11, %s1357_s7, 1  ;;  %1166 = vset.pattern.permute.xlu1 %v1283_v1  ;;  %1089 = vmatprep.subr.mxu1 %v378_v2  ;;  %v1055_v5 = vld [vmem:[%s1573_s6] ss:$0 sm:$0xff]  ;;  %v555_v16 = vshrl.u32 %v554_v15, 7 }
  0x3c   : > { %1085 = vmatpush3.xpose.msra.mxu0 %v378_v2  ;;  %v396_v6 = vld [vmem:[%s1572_s5] sm:$0x1]  ;;  %1090 = vmatpush3.xpose.msra.mxu1 %v378_v2  ;;  %p1584_p12 = scmp.ne.s32.totalorder %s1579_s18, 0  ;;  %s1285_s11 = smov [#allocation6]  }
  0x3d   : > { %s1067_s28 = sshll.u32 %s1452_s25, 4  ;;  %v1054_v7 = vld [vmem:[%s1571_s4] ss:$0 sm:$0xff]  ;;  %1094 = vmatprep.subr.mxu0 %v378_v2  ;;  %v556_v19 = vsub.s32 0, %v555_v16  ;;  %s375_s24 = scalar_lea.vmem %s1570_s3, %s1452_s25  ;;  %1111 = vmatprep.subr.bf16.mxu1 %v1284_v61 }
  0x3e   : > { %s367_s23 = scalar_lea.vmem %s1567_s0, %s1067_s28  ;;  %s372_s26 = scalar_lea.vmem %s1569_s2, %s1067_s28  ;;  %v1056_v31 = vld [vmem:[%s375_s24] ss:$0 sm:$0xff] }
  0x3f   : > { %v1463_v3 = vld [vmem:[%s367_s23] sm:$0xff]  ;;  %v1465_v4 = vld [vmem:[%s367_s23 + $0x8] sm:$0xff]  ;;  %1087 = vmatmul.mubr.f32.vlgmr.msra.gmra.mrb[0].mxu0 %v396_v6  ;;  %s1069_s25 = sshll.u32 %s1357_s7, 10  ;;  %s923_s7 = scalar_lea.sflag [#allocation5], %s1441_s13 }
  0x40   : > { %910 = vst [vmem:[%s1470_s21] sm:$0xff] %v1463_v3  ;;  %911 = vst [vmem:[%s1470_s21 + $0x20] sm:$0xff] %v1465_v4  ;;  %v474_v8 = vmul.f32 %v1055_v5, %v1463_v3  ;;  %v475_v9 = vmul.f32 %v1055_v5, %v1465_v4  ;;  %v390_v10 = vmul.f32 %v1054_v7, %v1463_v3  ;;  %v379_v11 = vld [vmem:[%s372_s26] sm:$0xff]  ;;  %v380_v12 = vld [vmem:[%s372_s26 + $0x8] sm:$0xff]  ;;  %1095 = vmatpush3.msra.mxu0 %v378_v2  ;;  %s936_s26 = sshll.u32 %s1470_s21, 4  ;;  %s1518_s28 = scalar_lea.hbm %s1575_s8, %s1069_s25  ;;  %s1520_s26 = int_to_ptr.vmem [resolvable:$true] %s936_s26 }
  0x41   : > { %605 = vperm.xlu1 %1166, %v379_v11   ;;  %v391_v13 = vmul.f32 %v1054_v7, %v1465_v4  ;;  %v476_v18 = vstv %s382_s27  ;;  %v1112_v59 = vpack.c.bf16 %v1465_v4, %v1463_v3  ;;  %s1212_s22 = scalar_lea.vmem %s1520_s26, 1024  ;;  %s1216_s17 = sshll.u32 %s1285_s11, 4  ;;  %s1217_s17 = int_to_ptr.vmem [resolvable:$false] %s1216_s17 }
  0x42   : > { %1091 = vmatprep.mubr.f32.mxu1 %v474_v8  ;;  %392 = vadd.xlane.f32.xlu0 %v390_v10  ;;  %p1213_p6 = scmp.ne.s32.totalorder %s1520_s26, %s1212_s22  ;;  %s1218_s27 = scalar_lea.vmem %s1217_s17, 2048 }
  0x43   : > { %1092 = vmatmul.mubr.f32.vlgmr.msra.gmra.mrb[0].mxu1 %v475_v9  ;;  %p1219_p10 = scmp.lt.s32.totalorder %s1520_s26, %s1217_s17  ;;  %p1220_p2 = scmp.lt.s32.totalorder %s1218_s27, %s1212_s22 }
  0x44   : > { %1103 = vmatprep.mubr.msk.f32.mxu1 %vm1282_vm0, %v1281_v0  ;;  %1113 = vmatpush3.bf16.msra.mxu1 %v1112_v59  ;;  %p1214_p13 = pnand %p1213_p6, %p1584_p12 }
  0x45   : > { %610 = vperm.xlu1 %1166, %v380_v12   ;;  %p1221_p4 = por %p1220_p2, %p1219_p10 }
  0x46   : > { %394 = vadd.xlane.f32.xlu0 %v391_v13  ;;  %p1215_p7 = pneg %p1214_p13 }
  0x48   : > { %p1222_p5 = pnand %p1221_p4, %p1215_p7 }
  0xc0   : > { %v606_v21 = vpop.permute.xlu1 %605 }
  0xc4   : > { %v611_v32 = vpop.permute.xlu1 %610 }
  0xcf   : > { %v393_v14 = vpop.xlane.xlu0 %392 }
  0xd0   : > { %v477_v23 = vadd.f32 %v476_v18, %v393_v14 }
  0xd3   : > { %v395_v17 = vpop.xlane.xlu0 %394 }
  0xd4   : > { %v478_v20 = vadd.f32 %v476_v18, %v395_v17 }
 0x112   : > { %v463_v22 = vpop.f32.mrb[0].mxu0 }
 0x113   : > { %v557_v24 = vrot.slane %v463_v22, %v556_v19  ;;  %v1088_v26 = vpop.f32.mrb[1].mxu0 }
 0x116   : > { %v1093_v25 = vpop.f32.mrb[0].mxu1 }
 0x117   : > { %v551_v27 = vadd.f32 %v1093_v25, %v478_v20  ;;  %v545_v28 = vpop.f32.mrb[1].mxu1 }
 0x118   : > { %v546_v29 = vadd.f32 %v545_v28, %v477_v23 }
 0x119   : > { %v559_v30 = vadd.f32 %v557_v24, %v551_v27 }
 0x11a   : > { %v558_v33 = vadd.f32 %v557_v24, %v546_v29 }
 0x11b   : > { %v614_v34 = vadd.f32 %v611_v32, %v559_v30  ;;  %v567_v40 = vadd.f32 %v1056_v31, %v559_v30 }
 0x11c   : > { %v613_v35 = vadd.f32 %v606_v21, %v558_v33  ;;  %v566_v36 = vadd.f32 %v1056_v31, %v558_v33 }
 0x11d   : > { %v616_v37 = vsel %vm568_vm1, %v614_v34, -inf  ;;  %v572_v43 = vsel %vm568_vm1, %v567_v40, -inf }
 0x11e   : > { %v615_v38 = vsel %vm568_vm1, %v613_v35, -inf  ;;  %v569_v39 = vsel %vm568_vm1, %v566_v36, -inf }
 0x11f   : > { %v617_v41 = vmax.f32 %v615_v38, %v616_v37  ;;  %570 = vmax.xlane.f32.xlu1 %v569_v39 }
 0x121   : > { %v618_v42 = vrot.slane %v617_v41, 4 }
 0x123   : > { %v619_v44 = vmax.f32 %v617_v41, %v618_v42  ;;  %573 = vmax.xlane.f32.xlu1 %v572_v43 }
 0x125   : > { %v620_v45 = vrot.slane %v619_v44, 2 }
 0x127   : > { %v621_v46 = vmax.f32 %v619_v44, %v620_v45 }
 0x129   : > { %v622_v47 = vrot.slane %v621_v46, 1 }
 0x12b   : > { %v623_v48 = vmax.f32 %v621_v46, %v622_v47 }
 0x12d   : > { %v624_v49 = vsub.f32 %v613_v35, %v623_v48  ;;  %v625_v50 = vsub.f32 %v614_v34, %v623_v48 }
 0x12f   : > { %v626_v51 = vmul.f32 1.442695, %v624_v49  ;;  %v628_v52 = vmul.f32 1.442695, %v625_v50 }
 0x131   : > { %1168 = vpow2.f32 %v626_v51 }
 0x132   : > { %1170 = vpow2.f32 %v628_v52 }
 0x13b   : > { %v1169_v53 = vpop.eup %1168 }
 0x13c   : > { %v1171_v54 = vpop.eup %1170  ;;  %v630_v55 = vsel %vm568_vm1, %v1169_v53, 0.0 }
 0x13d   : > { %v631_v56 = vsel %vm568_vm1, %v1171_v54, 0.0 }
 0x13e   : > { %v632_v57 = vadd.f32 %v631_v56, %v630_v55 }
 0x140   : > { %v633_v58 = vrot.slane %v632_v57, 4 }
 0x142   : > { %v634_v60 = vadd.f32 %v633_v58, %v632_v57 }
 0x144   : > { %v635_v62 = vrot.slane %v634_v60, 2 }
 0x146   : > { %v636_v63 = vadd.f32 %v635_v62, %v634_v60 }
 0x148   : > { %v637_v0 = vrot.slane %v636_v63, 1 }
 0x14a   : > { %v638_v2 = vadd.f32 %v637_v0, %v636_v63 }
 0x14c   : > { %1172 = vrcp.f32 %v638_v2 }
 0x156   : > { %v1173_v5 = vpop.eup %1172 }
 0x157   : > { %v640_v6 = vmul.f32 %v1173_v5, %v638_v2 }
 0x159   : > { %v641_v7 = vsub.f32 2.0, %v640_v6 }
 0x15b   : > { %v642_v8 = vmul.f32 %v1173_v5, %v641_v7 }
 0x15d   : > { %v643_v9 = vmul.f32 %v642_v8, %v638_v2 }
 0x15f   : > { %v644_v10 = vsub.f32 2.0, %v643_v9 }
 0x161   : > { %v645_v11 = vmul.f32 %v644_v10, %v642_v8 }
 0x163   : > { %v646_v12 = vmul.f32 %v1169_v53, %v645_v11  ;;  %v647_v13 = vmul.f32 %v1171_v54, %v645_v11 }
 0x165   : > { %729 = vxpose.xlu0.b32.start [1/2] (short) (narrow) %v646_v12, 8 }
 0x169   : > { %730 = vxpose.xlu0.b32.end [2/2] (short) (narrow) %v647_v13, 8 }
 0x192   : > { %1167 = vset.pattern.permute.xlu0 %v1283_v1 }
 0x1ac   : > { %v571_v14 = vpop.xlane.xlu1 %570 }
 0x1ad   : > { %v575_v15 = vsub.f32 %v566_v36, %v571_v14 }
 0x1af   : > { %v577_v16 = vmul.f32 1.442695, %v575_v15 }
 0x1b0   : > { %v574_v17 = vpop.xlane.xlu1 %573 }
 0x1b1   : > { %1174 = vpow2.f32 %v577_v16  ;;  %v576_v18 = vsub.f32 %v567_v40, %v574_v17 }
 0x1b3   : > { %v579_v19 = vmul.f32 1.442695, %v576_v18 }
 0x1b5   : > { %1176 = vpow2.f32 %v579_v19 }
 0x1bb   : > { %v1175_v20 = vpop.eup %1174 }
 0x1bc   : > { %v581_v21 = vsel %vm568_vm1, %v1175_v20, 0.0 }
 0x1bd   : > { %582 = vadd.xlane.f32.xlu1 %v581_v21 }
 0x1bf   : > { %v1177_v22 = vpop.eup %1176 }
 0x1c0   : > { %v584_v23 = vsel %vm568_vm1, %v1177_v22, 0.0 }
 0x1c1   : > { %585 = vadd.xlane.f32.xlu1 %v584_v23 }
 0x1e5   : > { %v745_v24 = vpop.trf.xlu0 }
 0x1e6   : > { %1104 = vmatmul.mubr.msk.f32.vlgmr.msra.gmra.mrb[2].mxu1 %vm761_vm2, %v745_v24 }
 0x24a   : > { %v583_v1 = vpop.xlane.xlu1 %582 }
 0x24b   : > { %1178 = vrcp.f32 %v583_v1 }
 0x24e   : > { %v586_v25 = vpop.xlane.xlu1 %585 }
 0x24f   : > { %1180 = vrcp.f32 %v586_v25 }
 0x255   : > { %v1179_v26 = vpop.eup %1178 }
 0x256   : > { %v589_v27 = vmul.f32 %v1179_v26, %v583_v1 }
 0x258   : > { %v591_v28 = vsub.f32 2.0, %v589_v27 }
 0x259   : > { %v1181_v29 = vpop.eup %1180 }
 0x25a   : > { %v593_v30 = vmul.f32 %v1179_v26, %v591_v28  ;;  %v590_v31 = vmul.f32 %v1181_v29, %v586_v25 }
 0x25c   : > { %v595_v32 = vmul.f32 %v593_v30, %v583_v1  ;;  %v592_v33 = vsub.f32 2.0, %v590_v31 }
 0x25e   : > { %v597_v34 = vsub.f32 2.0, %v595_v32  ;;  %v594_v35 = vmul.f32 %v1181_v29, %v592_v33 }
 0x260   : > { %v599_v36 = vmul.f32 %v597_v34, %v593_v30  ;;  %v596_v37 = vmul.f32 %v594_v35, %v586_v25 }
 0x262   : > { %v598_v38 = vsub.f32 2.0, %v596_v37  ;;  %v601_v39 = vmul.f32 %v1175_v20, %v599_v36 }
 0x264   : > { %v600_v40 = vmul.f32 %v598_v38, %v594_v35  ;;  %1096 = vmatprep.mubr.msk.f32.mxu0 %vm568_vm1, %v601_v39 }
 0x266   : > { %v602_v41 = vmul.f32 %v1177_v22, %v600_v40 }
 0x268   : > { %1097 = vmatmul.mubr.msk.f32.vlgmr.msra.gmra.mrb[2].mxu0 %vm568_vm1, %v602_v41 }
 0x269   : > { %1108 = vmatprep.mubr.msk.f32.mxu0 %vm568_vm1, %v601_v39 }
 0x2b9   : > { %v831_v42 = vpop.f32.mrb[2].mxu1 }
 0x2ba   : > { %v1105_v43 = vpop.f32.mrb[3].mxu1  ;;  %1106 = vmatprep.subr.mxu0 %v831_v42 }
 0x2bb   : > { %1107 = vmatpush3.msra.mxu0 %v831_v42 }
 0x2bc   : > { %1109 = vmatmul.mubr.msk.f32.vlgmr.msra.gmra.mrb[4].mxu0 %vm568_vm1, %v602_v41 }
 0x33b   : > { %v1098_v44 = vpop.f32.mrb[2].mxu0 }
 0x33c   : > { %913 = vst [vmem:[%s1470_s21 + $0x28] sm:$0xff] %v1098_v44  ;;  %v915_v45 = vmul.f32 %v1098_v44, %v1465_v4  ;;  %v720_v46 = vpop.f32.mrb[3].mxu0 }
 0x33d   : > { %912 = vst [vmem:[%s1470_s21 + $0x8] sm:$0xff] %v720_v46  ;;  %v914_v47 = vmul.f32 %v720_v46, %v1463_v3 }
 0x33e   : > { %917 = vst [vmem:[%s1470_s21 + $0x30] sm:$0xff] %v915_v45 }
 0x33f   : > { %916 = vst [vmem:[%s1470_s21 + $0x10] sm:$0xff] %v914_v47 }
 0x38f   : > { %v1110_v48 = vpop.f32.mrb[4].mxu0 }
 0x390   : > { %v919_v49 = vmul.f32 %v1110_v48, %v1465_v4  ;;  %v901_v50 = vpop.f32.mrb[5].mxu0 }
 0x391   : > { %v918_v51 = vmul.f32 %v901_v50, %v1463_v3 }
 0x392   : > { %921 = vst [vmem:[%s1470_s21 + $0x38] sm:$0xff] %v919_v49 }
 0x393   : > { %920 = vst [vmem:[%s1470_s21 + $0x18] sm:$0xff] %v918_v51 }
 0x394   : > { %1225 = shalt.err (!%p1222_p5)
}
 0x395   : > { %s1226_s21 = scalar_lea.hbm %s1518_s28, 1024  ;;  %s1230_s24 = scalar_lea.hbm %s1575_s8, 2048 }
 0x396   : > { %p1227_p8 = scmp.ne.s32.totalorder %s1518_s28, %s1226_s21  ;;  %p1231_p1 = scmp.lt.u32.totalorder %s1518_s28, %s1575_s8 }
 0x397   : > { %p1232_p3 = scmp.lt.u32.totalorder %s1230_s24, %s1226_s21  ;;  %p1234_p6 = scmp.lt.u32.totalorder %s1226_s21, %s1518_s28 }
 0x398   : > { %p1228_p9 = pnand %p1227_p8, %p1584_p12 }
 0x399   : > { %p1233_p11 = por %p1232_p3, %p1231_p1 }
 0x39a   : > { %p1229_p0 = pneg %p1228_p9 }
 0x39b   : > { %p1235_p13 = por %p1234_p6, %p1233_p11 }
 0x39d   : > { %p1236_p7 = pnand %p1235_p13, %p1229_p0 }
 0x39f   : > { %1239 = shalt.err (!%p1236_p7)
}
 0x3a0   : > { %s1286_s16 = smov 512   ;;  %s1287_s22 = smov 32  }
 0x3a1   : > { %1116 = dma.vmem_to_hbm [thread:$0]  (%p1584_p12), %s1520_s26, 1024, %s1518_s28, %s923_s7, %s1286_s16, %s1286_s16, %s1287_s22  }
 0x3a2 PF: > { %s951_s11 = sand.u32 1, %s1266_s29   ;;  %p1585_p10 = scmp.ne.s32.totalorder %s1580_s19, 0 }
 0x3a3   : > { %p1586_p2 = scmp.ge.s32.totalorder %s1278_s10, 2  ;;  %s952_s17 = scalar_lea.sflag [#allocation5], %s951_s11 }
 0x3a5   : > { %p1123_p4 = pnand %p1586_p2, %p1585_p10 }
 0x3a7   : > { %1261 = dma.done.wait (!%p1123_p4), %s952_s17, 1024  }
 0x3a8   : > { %1263 = vsyncadd (!%p1123_p4), %s952_s17, 4294966272  ;;  %p22_p5 = scmp.ge.s32.totalorder %s1361_s12, 4   ;;  %s1587_s29 = smov %s1270_s30 }
 0x3a9   : > { %s1588_s30 = smov %s1274_s9  ;;  %s1589_s9 = smov %s1373_s15 }
 0x3aa   : > { %s1590_s10 = smov %s1361_s12  ;;  %24 = sbr.rel (!%p22_p5) target bundleno = 7 (0x7), region = 106 }
 0x3b1   :  { %957 = vsyncpa [#allocation4], 1 }
 0x3b2   :  { %959 = vsyncpa [#allocation4 + $0x1], 1 }
 0x3b3   :  { %960 = vsyncpa [#allocation5], 1 }
 0x3b4   :  { %962 = vsyncpa [#allocation5 + $0x1], 1 }

</bundles_post_ra>
